<compile_context>
chip_gen: v7x
topology: tpu7x:2x2x1
jax: 0.10.0
libtpu: 0.0.40
codegen_flags: <defaults>
</compile_context>

<pallas_src>
import jax
import jax.numpy as jnp
from jax.experimental import pallas as pl
from jax.experimental.pallas import tpu as pltpu


def _add_transpose_kernel_2d(x_ref, o_ref):
    # x_ref : (tH, tW) VMEM tile (batch dim squeezed)
    # o_ref : (tW, tH) VMEM tile
    xv = x_ref[...]            # single load of the tile
    o_ref[...] = (xv + xv).T   # add on VPU, tile transpose on XLU
    # TODO(synk): if bundle dumps show a staged VMEM temp for the transpose,
    # write 128-wide transposed strips directly to o_ref instead.


def _add_transpose_kernel_3d(x_ref, o_ref):
    # x_ref : (bB, tH, tW) block (several batches per step)
    # o_ref : (bB, tW, tH) block
    xv = x_ref[...]
    o_ref[...] = jnp.swapaxes(xv + xv, -1, -2)


def _pick_tile(dim: int, target: int, granule: int = 128) -> int:
    """Largest multiple of `granule` that divides `dim` and is <= `target`.

    Falls back to the full dim (always a legal block size) when the dim is not
    a multiple of `granule`, or returns the whole dim when it is already small.
    """
    if dim % granule != 0 or dim <= target:
        return dim
    best = granule
    t = granule
    while t <= target:
        if dim % t == 0:
            best = t
        t += granule
    return best


def _largest_divisor_leq(n: int, target: int) -> int:
    target = max(1, min(n, target))
    for d in range(target, 0, -1):
        if n % d == 0:
            return d
    return 1


def add_then_transpose(x: jax.Array, dim0: int, dim1: int,
                       *, target_tile: int = 1024) -> jax.Array:
    """Pallas equivalent of ModelFromAnotherOp.forward with torch.transpose."""
    ndim = x.ndim
    d0 = dim0 % ndim
    d1 = dim1 % ndim
    # TODO(synk): generalize index_map-based transposes for arbitrary dim pairs.
    assert ndim == 3 and {d0, d1} == {ndim - 2, ndim - 1}, (
        "kernel implements transpose over the last two dims of a 3-D tensor"
    )

    B, H, W = x.shape
    itemsize = x.dtype.itemsize

    # Scoped-VMEM limit: 64 MiB on v5e/v6e (128 MiB physical), 32 MiB on v7x
    # (64 MiB physical) or when the query is unavailable.
    try:
        vmem_cap = pltpu.get_tpu_info().vmem_capacity_bytes
    except Exception:
        vmem_cap = 64 * 1024 * 1024
    vmem_limit = min(64 * 1024 * 1024, max(32 * 1024 * 1024, vmem_cap // 2))
    budget = (vmem_limit * 3) // 4  # leave headroom for compiler scratch

    tH = _pick_tile(H, target_tile)
    tW = _pick_tile(W, target_tile)

    # Small-slab / large-batch regime: block several batches per grid step so
    # the fixed per-step overhead (~0.35 us) is amortized.
    bB = 1
    if B > 1 and H * W * itemsize < 512 * 1024:
        desired = max(1, (2 * 1024 * 1024) // max(1, H * W * itemsize))
        bB = _largest_divisor_leq(B, desired)

    def _footprint(b, h, w):
        # double-buffered input tile + double-buffered output tile
        return 4 * b * h * w * itemsize

    # Guard ragged full-dim fallbacks / oversized tiles against the budget.
    while _footprint(bB, tH, tW) > budget:
        if bB > 1:
            bB = _largest_divisor_leq(B, bB // 2)
        elif tH % 256 == 0:
            tH //= 2
        elif tW % 256 == 0:
            tW //= 2
        else:
            # TODO(synk): add masked ragged edge blocks for non-128-aligned
            # dims instead of a full-extent fallback tile.
            break

    nH, nW = H // tH, W // tW
    # Output's last dim is H; keep the axis that advances its block index (i)
    # innermost so consecutive writeback DMAs land contiguously in (B, W, H).
    grid = (B // bB, nW, nH)

    out_shape = jax.ShapeDtypeStruct((B, W, H), x.dtype)

    cost = pl.CostEstimate(
        flops=B * H * W,                           # the x + x adds
        transcendentals=0,
        bytes_accessed=2 * B * H * W * itemsize,   # read x, write out
    )

    if bB == 1:
        kernel = _add_transpose_kernel_2d
        in_spec = pl.BlockSpec((pl.Squeezed(), tH, tW),
                               lambda b, j, i: (b, i, j))
        out_spec = pl.BlockSpec((pl.Squeezed(), tW, tH),
                                lambda b, j, i: (b, j, i))
    else:
        kernel = _add_transpose_kernel_3d
        in_spec = pl.BlockSpec((bB, tH, tW), lambda b, j, i: (b, i, j))
        out_spec = pl.BlockSpec((bB, tW, tH), lambda b, j, i: (b, j, i))

    return pl.pallas_call(
        kernel,
        out_shape=out_shape,
        grid_spec=pltpu.PrefetchScalarGridSpec(
            num_scalar_prefetch=0,
            grid=grid,
            in_specs=[in_spec],
            out_specs=out_spec,
        ),
        compiler_params=pltpu.CompilerParams(
            # Every grid step writes a distinct output block -> fully parallel
            # (lets megacore shard the grid across TensorCores on v7x).
            dimension_semantics=("parallel", "parallel", "parallel"),
            vmem_limit_bytes=vmem_limit,
        ),
        cost_estimate=cost,
    )(x)


if __name__ == "__main__":
    key = jax.random.PRNGKey(0)
    # 3-D tensor, transpose over the last two dims (kwargs of torch.transpose).
    x = jax.random.normal(key, (2, 256, 512), dtype=jnp.float32)
    dim0, dim1 = -2, -1

    out = add_then_transpose(x, dim0, dim1)
    out = jax.block_until_ready(out)

    # Reference check (plain JAX): transpose(x + x, dim0, dim1)
    ref = jnp.swapaxes(x + x, dim0, dim1)
    assert out.shape == ref.shape, (out.shape, ref.shape)
    assert jnp.allclose(out, ref), "mismatch vs reference"

    print("KERNEL_OK")
</pallas_src>

<mosaic_0001>
module attributes {stable_mosaic.version = 11 : i64} {
  func.func @_add_transpose_kernel_2d(%arg0: i32, %arg1: i32, %arg2: i32, %arg3: memref<1x256x512xf32, #tpu.memory_space<vmem>>, %arg4: memref<1x512x256xf32, #tpu.memory_space<vmem>>) attributes {dimension_semantics = [#tpu.dimension_semantics<parallel>, #tpu.dimension_semantics<parallel>, #tpu.dimension_semantics<parallel>], iteration_bounds = array<i64: 2, 1, 1>, scalar_prefetch = 0 : i64, scratch_operands = 0 : i64, tpu.core_type = #tpu.core_type<tc>, window_params = [{transform_indices = @transform_0, window_bounds = array<i64: 1, 256, 512>}, {transform_indices = @transform_1, window_bounds = array<i64: 1, 512, 256>}]} {
    %c0 = arith.constant 0 : index
    %c0_0 = arith.constant 0 : index
    %c0_1 = arith.constant 0 : index
    %0 = vector.load %arg3[%c0, %c0_0, %c0_1] : memref<1x256x512xf32, #tpu.memory_space<vmem>>, vector<1x256x512xf32>
    %1 = vector.shape_cast %0 : vector<1x256x512xf32> to vector<256x512xf32>
    %2 = arith.addf %1, %1 : vector<256x512xf32>
    %3 = tpu.transpose %2, [1, 0] : vector<256x512xf32> -> vector<512x256xf32>
    %c0_2 = arith.constant 0 : index
    %c0_3 = arith.constant 0 : index
    %c0_4 = arith.constant 0 : index
    %4 = vector.load %arg4[%c0_2, %c0_3, %c0_4] : memref<1x512x256xf32, #tpu.memory_space<vmem>>, vector<1x512x256xf32>
    %5 = vector.shape_cast %4 : vector<1x512x256xf32> to vector<512x256xf32>
    %6 = vector.shape_cast %3 : vector<512x256xf32> to vector<1x512x256xf32>
    tpu.vector_store %arg4[%c0_2, %c0_3, %c0_4], %6 {strides = array<i32>} : memref<1x512x256xf32, #tpu.memory_space<vmem>>, vector<1x512x256xf32>,
    return
  }
  func.func @transform_0(%arg0: i32, %arg1: i32, %arg2: i32) -> (i32, i32, i32) {
    %c0_i32 = arith.constant 0 : i32
    return %arg0, %arg2, %arg1 : i32, i32, i32
  }
  func.func @transform_1(%arg0: i32, %arg1: i32, %arg2: i32) -> (i32, i32, i32) {
    %c0_i32 = arith.constant 0 : i32
    return %arg0, %arg1, %arg2 : i32, i32, i32
  }
}

</mosaic_0001>

<bundles_post_ra>
// kernel: tpu_custom_call.1
= control target key start
LH: loop header
LB: loop body
LE: loop exit
PB: predicated region body
PF: predicated region fallthrough
CT: control target
= control target key end

     0   :  { %6 = vsyncpa [#allocation3], 0  ;;  %s1577_s0 = inlined_call_operand.hbm [shape: f32[2,256,512], index: 0, kind: input, shape index: {}]   ;;  %s1578_s1 = inlined_call_operand.hbm [shape: f32[2,512,256], index: 1, kind: output, shape index: {}]  }
   0x1   :  { %8 = vsyncpa [#allocation3 + $0x1], 0 }
   0x2   :  { %9 = vsyncpa [#allocation4], 0 }
   0x3   :  { %11 = vsyncpa [#allocation4 + $0x1], 0  ;;  %s1137_s6 = smov 0   ;;  %s1139_s7 = smov 0  }
   0x4   :  { %s1141_s8 = smov 0   ;;  %s1143_s9 = smov 0  }
   0x5   :  { %s1145_s10 = smov 0   ;;  %s1147_s11 = smov 0  }
   0x6 LB: > { %s924_s12 = sadd.s32 4294967295, %s1119_s11   ;;  %s925_s13 = sadd.s32 4294967294, %s1119_s11   ;;  %s1119_s11 = sphi %s1147_s11, %s17_s11   ;;  %s1115_s10 = sphi %s1145_s10, %s1593_s10   ;;  %s1111_s9 = sphi %s1143_s9, %s1592_s9   ;;  %s1107_s8 = sphi %s1141_s8, %s1591_s8   ;;  %s1103_s7 = sphi %s1139_s7, %s1590_s7   ;;  %s1099_s6 = sphi %s1137_s6, %s1589_s6  }
   0x7   : > { %s36_s14 = sadd.s32 1, %s1115_s10  ;;  %s47_s15 = sadd.s32 1, %s1107_s8 }
   0x8   : > { %p38_p0 = scmp.ge.s32.totalorder %s36_s14, 2  ;;  %p54_p1 = scmp.ne.s32.totalorder %s1107_s8, %s1103_s7 }
   0x9   : > { %p55_p2 = scmp.eq.s32.totalorder %s1119_s11, 0  ;;  %p60_p3 = scmp.ne.s32.totalorder %s1103_s7, %s1099_s6 }
   0xa   : > { %s1595_s14 = smov (%p38_p0, %s36_s14), 0  ;;  %p61_p5 = scmp.eq.s32.totalorder %s924_s12, 0 }
   0xb   : > { %p1178_p4 = por %p55_p2, %p54_p1  ;;  %s40_s17 = ssub.s32 %s1115_s10, %s1595_s14 }
   0xc   : > { %p88_p6 = scmp.eq.s32.totalorder %s924_s12, 1  ;;  %p45_p7 = scmp.eq.s32.totalorder %s40_s17, 0 }
   0xd   : > { %p1184_p8 = por %p61_p5, %p60_p3  ;;  %p94_p10 = scmp.eq.s32.totalorder %s925_s13, 1 }
   0xe   : > { %p1188_p9 = por %p88_p6, %p54_p1  ;;  %p953_p13 = scmp.lt.s32.totalorder %s1119_s11, 2 }
   0xf   : > { %s1193_s20 = scalar_select %p45_p7, %s1107_s8, %s47_s15  }
  0x10   : > { %s1582_s19 = scalar_select %p1188_p9, 1, 0 }
  0x11   : > { %p1195_p11 = por %p94_p10, %p60_p3  ;;  %s114_s22 = sand.u32 1, %s1107_s8  }
  0x12   : > { %s928_s23 = sshll.u32 %s114_s22, 10  ;;  %s939_s24 = sshll.u32 %s1115_s10, 14 }
  0x13   : > { %s1583_s21 = scalar_select %p1195_p11, 1, 0 }
  0x14   : > { %s1206_s27 = scalar_lea.hbm %s1577_s0, %s939_s24  ;;  %s118_s28 = scalar_lea.vmem [#allocation2], %s928_s23 }
  0x15   : > { %s130_s29 = sshll.u32 %s118_s28, 4  ;;  %p1212_p0 = pnand %p953_p13, %p1178_p4  ;;  %s1208_s29 = int_to_ptr.vmem [resolvable:$true] %s130_s29 }
  0x16   : > { %s1217_s2 = scalar_lea.sflag [#allocation3], %s114_s22  ;;  %s1007_s3 = scalar_lea.hbm %s1206_s27, 16384 }
  0x17   : > { %p1008_p2 = scmp.ne.s32.totalorder %s1206_s27, %s1007_s3  ;;  %p1009_p3 = pneg %p1212_p0 }
  0x18   : > { %s1012_s12 = scalar_lea.hbm %s1577_s0, 32768  ;;  %p1013_p4 = scmp.lt.u32.totalorder %s1206_s27, %s1577_s0 }
  0x19   : > { %p1010_p5 = pnand %p1009_p3, %p1008_p2  ;;  %p1014_p7 = scmp.lt.u32.totalorder %s1012_s12, %s1007_s3 }
  0x1a   : > { %p1016_p13 = scmp.lt.u32.totalorder %s1007_s3, %s1206_s27 }
  0x1b   : > { %p1011_p6 = pneg %p1010_p5  ;;  %p1015_p10 = por %p1014_p7, %p1013_p4 }
  0x1d   : > { %p1017_p12 = por %p1016_p13, %p1015_p10 }
  0x1f   : > { %p1018_p1 = pnand %p1017_p12, %p1011_p6 }
  0x21   : > { %1021 = shalt.err (!%p1018_p1)
}
  0x22   : > { %s1022_s16 = scalar_lea.vmem %s1208_s29, 16384  ;;  %s1121_s17 = smov [#allocation2]  }
  0x23   : > { %p1023_p2 = scmp.ne.s32.totalorder %s1208_s29, %s1022_s16  ;;  %s1027_s22 = sshll.u32 %s1121_s17, 4  ;;  %s1028_s22 = int_to_ptr.vmem [resolvable:$false] %s1027_s22 }
  0x24   : > { %s1029_s23 = scalar_lea.vmem %s1028_s22, 32768  ;;  %p1030_p9 = scmp.lt.s32.totalorder %s1208_s29, %s1028_s22 }
  0x25   : > { %p1025_p5 = pnand %p1023_p2, %p1009_p3  ;;  %p1031_p4 = scmp.lt.s32.totalorder %s1029_s23, %s1022_s16 }
  0x27   : > { %p1026_p11 = pneg %p1025_p5  ;;  %p1032_p7 = por %p1031_p4, %p1030_p9 }
  0x29   : > { %p1033_p10 = pnand %p1032_p7, %p1026_p11 }
  0x2b   : > { %1036 = shalt.err (!%p1033_p10)
}
  0x2c   : > { %s1122_s24 = smov 512   ;;  %s1123_s25 = smov 32  }
  0x2d   : > { %948 = dma.hbm_to_vmem [thread:$0]  (!%p1212_p0), %s1206_s27, 16384, %s1208_s29, %s1217_s2, %s1122_s24, %s1122_s24, %s1123_s25  }
  0x2e   : > { %p138_p12 = scmp.lt.s32.totalorder %s1119_s11, 3  ;;  %p1585_p1 = scmp.ge.s32.totalorder %s1119_s11, 1 }
  0x30   : > { %p139_p3 = pnand %p1585_p1, %p138_p12 }
  0x31   : > { %s1249_s26 = sand.u32 (!%p139_p3), 1, %s1103_s7  }
  0x32   : > { %142 = sbr.rel (%p139_p3) target bundleno = 457 (0x1c9), region = 24  ;;  %s932_s28 = sshll.u32 (!%p139_p3), %s1249_s26, 10 }
  0x33   : > { %s145_s3 = scalar_lea.sflag (!%p139_p3), [#allocation3], %s1249_s26  ;;  %s1255_s4 = scalar_lea.vmem (!%p139_p3), [#allocation2], %s932_s28 }
  0x39   : > { %1090 = dma.done.wait (%p1184_p8), %s145_s3, 16384  }
  0x3a   : > { %1092 = vsyncadd (%p1184_p8), %s145_s3, 4294950912  ;;  %v172_v0 = vld [vmem:[%s1255_s4 + $0x8] sm:$0xff]  ;;  %v171_v1 = vld [vmem:[%s1255_s4] sm:$0xff]  ;;  %s1331_s18 = scalar_lea.vmem [#allocation5], %s932_s28  ;;  %s940_s27 = sshll.u32 %s1111_s9, 14 }
  0x3b   : > { %v176_v2 = vld [vmem:[%s1255_s4 + $0x28] sm:$0xff]  ;;  %v300_v3 = vadd.f32 %v172_v0, %v172_v0  ;;  %v299_v4 = vadd.f32 %v171_v1, %v171_v1  ;;  %v175_v5 = vld [vmem:[%s1255_s4 + $0x20] sm:$0xff]  ;;  %v174_v0 = vld [vmem:[%s1255_s4 + $0x18] sm:$0xff]  ;;  %s830_s29 = sshll.u32 %s1331_s18, 4  ;;  %s1524_s5 = scalar_lea.hbm %s1578_s1, %s940_s27  ;;  %s1526_s29 = int_to_ptr.vmem [resolvable:$true] %s830_s29 }
  0x3c   : > { %v304_v6 = vadd.f32 %v176_v2, %v176_v2  ;;  %v303_v7 = vadd.f32 %v175_v5, %v175_v5  ;;  %v180_v8 = vld [vmem:[%s1255_s4 + $0x48] sm:$0xff]  ;;  %v179_v9 = vld [vmem:[%s1255_s4 + $0x40] sm:$0xff]  ;;  %v173_v1 = vld [vmem:[%s1255_s4 + $0x10] sm:$0xff]  ;;  %v302_v2 = vadd.f32 %v174_v0, %v174_v0  ;;  %s812_s9 = scalar_lea.sflag [#allocation4], %s1249_s26  ;;  %s1037_s12 = scalar_lea.vmem %s1526_s29, 16384 }
  0x3d   : > { %459 = vxpose.xlu1.b32.start [1/16] %v300_v3, 128  ;;  %427 = vxpose.xlu0.b32.start [1/16] %v299_v4, 128  ;;  %v308_v10 = vadd.f32 %v180_v8, %v180_v8  ;;  %v307_v11 = vadd.f32 %v179_v9, %v179_v9  ;;  %v184_v12 = vld [vmem:[%s1255_s4 + $0x68] sm:$0xff]  ;;  %v183_v13 = vld [vmem:[%s1255_s4 + $0x60] sm:$0xff]  ;;  %v301_v3 = vadd.f32 %v173_v1, %v173_v1  ;;  %v178_v4 = vld [vmem:[%s1255_s4 + $0x38] sm:$0xff]  ;;  %p1038_p8 = scmp.ne.s32.totalorder %s1526_s29, %s1037_s12  ;;  %p1586_p9 = scmp.ne.s32.totalorder %s1582_s19, 0 }
  0x3e   : > { %v312_v14 = vadd.f32 %v184_v12, %v184_v12  ;;  %v311_v15 = vadd.f32 %v183_v13, %v183_v13  ;;  %v188_v16 = vld [vmem:[%s1255_s4 + $0x88] sm:$0xff]  ;;  %v187_v17 = vld [vmem:[%s1255_s4 + $0x80] sm:$0xff]  ;;  %v177_v5 = vld [vmem:[%s1255_s4 + $0x30] sm:$0xff]  ;;  %s1124_s13 = smov [#allocation5]  }
  0x3f   : > { %v316_v18 = vadd.f32 %v188_v16, %v188_v16  ;;  %v315_v19 = vadd.f32 %v187_v17, %v187_v17  ;;  %v192_v20 = vld [vmem:[%s1255_s4 + $0xa8] sm:$0xff]  ;;  %v191_v21 = vld [vmem:[%s1255_s4 + $0xa0] sm:$0xff]  ;;  %v182_v8 = vld [vmem:[%s1255_s4 + $0x58] sm:$0xff]  ;;  %p1039_p11 = pnand %p1038_p8, %p1586_p9  ;;  %s1041_s15 = sshll.u32 %s1124_s13, 4  ;;  %s1042_s15 = int_to_ptr.vmem [resolvable:$false] %s1041_s15 }
  0x40   : > { %v320_v22 = vadd.f32 %v192_v20, %v192_v20  ;;  %v319_v23 = vadd.f32 %v191_v21, %v191_v21  ;;  %v196_v24 = vld [vmem:[%s1255_s4 + $0xc8] sm:$0xff]  ;;  %v195_v25 = vld [vmem:[%s1255_s4 + $0xc0] sm:$0xff]  ;;  %v181_v9 = vld [vmem:[%s1255_s4 + $0x50] sm:$0xff]  ;;  %s1043_s16 = scalar_lea.vmem %s1042_s15, 32768  ;;  %p1044_p6 = scmp.lt.s32.totalorder %s1526_s29, %s1042_s15 }
  0x41   : > { %460 = vxpose.xlu1.b32.cont [2/16] %v304_v6, 128  ;;  %428 = vxpose.xlu0.b32.cont [2/16] %v303_v7, 128  ;;  %v324_v26 = vadd.f32 %v196_v24, %v196_v24  ;;  %v323_v27 = vadd.f32 %v195_v25, %v195_v25  ;;  %v200_v28 = vld [vmem:[%s1255_s4 + $0xe8] sm:$0xff]  ;;  %v199_v29 = vld [vmem:[%s1255_s4 + $0xe0] sm:$0xff]  ;;  %v306_v6 = vadd.f32 %v178_v4, %v178_v4  ;;  %v186_v12 = vld [vmem:[%s1255_s4 + $0x78] sm:$0xff]  ;;  %p1040_p0 = pneg %p1039_p11  ;;  %p1045_p13 = scmp.lt.s32.totalorder %s1043_s16, %s1037_s12 }
  0x42   : > { %v328_v30 = vadd.f32 %v200_v28, %v200_v28  ;;  %v327_v31 = vadd.f32 %v199_v29, %v199_v29  ;;  %v204_v32 = vld [vmem:[%s1255_s4 + $0x108] sm:$0xff]  ;;  %v203_v33 = vld [vmem:[%s1255_s4 + $0x100] sm:$0xff]  ;;  %v305_v7 = vadd.f32 %v177_v5, %v177_v5  ;;  %v185_v13 = vld [vmem:[%s1255_s4 + $0x70] sm:$0xff] }
  0x43   : > { %v332_v34 = vadd.f32 %v204_v32, %v204_v32  ;;  %v331_v35 = vadd.f32 %v203_v33, %v203_v33  ;;  %v208_v36 = vld [vmem:[%s1255_s4 + $0x128] sm:$0xff]  ;;  %v207_v37 = vld [vmem:[%s1255_s4 + $0x120] sm:$0xff]  ;;  %v190_v16 = vld [vmem:[%s1255_s4 + $0x98] sm:$0xff]  ;;  %p1046_p2 = por %p1045_p13, %p1044_p6 }
  0x44   : > { %v336_v38 = vadd.f32 %v208_v36, %v208_v36  ;;  %v335_v39 = vadd.f32 %v207_v37, %v207_v37  ;;  %v212_v40 = vld [vmem:[%s1255_s4 + $0x148] sm:$0xff]  ;;  %v211_v41 = vld [vmem:[%s1255_s4 + $0x140] sm:$0xff]  ;;  %v189_v17 = vld [vmem:[%s1255_s4 + $0x90] sm:$0xff] }
  0x45   : > { %461 = vxpose.xlu1.b32.cont [3/16] %v308_v10, 128  ;;  %429 = vxpose.xlu0.b32.cont [3/16] %v307_v11, 128  ;;  %v340_v42 = vadd.f32 %v212_v40, %v212_v40  ;;  %v339_v43 = vadd.f32 %v211_v41, %v211_v41  ;;  %v216_v44 = vld [vmem:[%s1255_s4 + $0x168] sm:$0xff]  ;;  %v215_v45 = vld [vmem:[%s1255_s4 + $0x160] sm:$0xff]  ;;  %v310_v10 = vadd.f32 %v182_v8, %v182_v8  ;;  %v194_v20 = vld [vmem:[%s1255_s4 + $0xb8] sm:$0xff]  ;;  %p1047_p5 = pnand %p1046_p2, %p1040_p0 }
  0x46   : > { %v344_v46 = vadd.f32 %v216_v44, %v216_v44  ;;  %v343_v47 = vadd.f32 %v215_v45, %v215_v45  ;;  %v220_v48 = vld [vmem:[%s1255_s4 + $0x188] sm:$0xff]  ;;  %v219_v49 = vld [vmem:[%s1255_s4 + $0x180] sm:$0xff]  ;;  %v309_v11 = vadd.f32 %v181_v9, %v181_v9  ;;  %v193_v21 = vld [vmem:[%s1255_s4 + $0xb0] sm:$0xff] }
  0x47   : > { %v348_v50 = vadd.f32 %v220_v48, %v220_v48  ;;  %v347_v51 = vadd.f32 %v219_v49, %v219_v49  ;;  %v224_v52 = vld [vmem:[%s1255_s4 + $0x1a8] sm:$0xff]  ;;  %v223_v53 = vld [vmem:[%s1255_s4 + $0x1a0] sm:$0xff]  ;;  %v198_v24 = vld [vmem:[%s1255_s4 + $0xd8] sm:$0xff] }
  0x48   : > { %v352_v54 = vadd.f32 %v224_v52, %v224_v52  ;;  %v351_v55 = vadd.f32 %v223_v53, %v223_v53  ;;  %v228_v56 = vld [vmem:[%s1255_s4 + $0x1c8] sm:$0xff]  ;;  %v227_v57 = vld [vmem:[%s1255_s4 + $0x1c0] sm:$0xff]  ;;  %v197_v25 = vld [vmem:[%s1255_s4 + $0xd0] sm:$0xff] }
  0x49   : > { %462 = vxpose.xlu1.b32.cont [4/16] %v312_v14, 128  ;;  %430 = vxpose.xlu0.b32.cont [4/16] %v311_v15, 128  ;;  %v356_v58 = vadd.f32 %v228_v56, %v228_v56  ;;  %v355_v59 = vadd.f32 %v227_v57, %v227_v57  ;;  %v232_v60 = vld [vmem:[%s1255_s4 + $0x1e8] sm:$0xff]  ;;  %v231_v61 = vld [vmem:[%s1255_s4 + $0x1e0] sm:$0xff]  ;;  %v314_v14 = vadd.f32 %v186_v12, %v186_v12  ;;  %v202_v28 = vld [vmem:[%s1255_s4 + $0xf8] sm:$0xff] }
  0x4a   : > { %v360_v62 = vadd.f32 %v232_v60, %v232_v60  ;;  %v359_v63 = vadd.f32 %v231_v61, %v231_v61  ;;  %v313_v15 = vadd.f32 %v185_v13, %v185_v13  ;;  %v201_v29 = vld [vmem:[%s1255_s4 + $0xf0] sm:$0xff]  ;;  %v206_v32 = vld [vmem:[%s1255_s4 + $0x118] sm:$0xff]  ;;  %v236_v0 = vld [vmem:[%s1255_s4 + $0x208] sm:$0xff] }
  0x4b   : > { %v205_v33 = vld [vmem:[%s1255_s4 + $0x110] sm:$0xff]  ;;  %v210_v36 = vld [vmem:[%s1255_s4 + $0x138] sm:$0xff]  ;;  %v235_v1 = vld [vmem:[%s1255_s4 + $0x200] sm:$0xff] }
  0x4c   : > { %v209_v37 = vld [vmem:[%s1255_s4 + $0x130] sm:$0xff]  ;;  %v214_v40 = vld [vmem:[%s1255_s4 + $0x158] sm:$0xff]  ;;  %v240_v4 = vld [vmem:[%s1255_s4 + $0x228] sm:$0xff] }
  0x4d   : > { %463 = vxpose.xlu1.b32.cont [5/16] %v316_v18, 128  ;;  %431 = vxpose.xlu0.b32.cont [5/16] %v315_v19, 128  ;;  %v318_v18 = vadd.f32 %v190_v16, %v190_v16  ;;  %v317_v19 = vadd.f32 %v189_v17, %v189_v17  ;;  %v213_v41 = vld [vmem:[%s1255_s4 + $0x150] sm:$0xff]  ;;  %v218_v44 = vld [vmem:[%s1255_s4 + $0x178] sm:$0xff]  ;;  %v239_v5 = vld [vmem:[%s1255_s4 + $0x220] sm:$0xff]  ;;  %v368_v8 = vadd.f32 %v240_v4, %v240_v4 }
  0x4e   : > { %v217_v45 = vld [vmem:[%s1255_s4 + $0x170] sm:$0xff]  ;;  %v222_v48 = vld [vmem:[%s1255_s4 + $0x198] sm:$0xff]  ;;  %v367_v9 = vadd.f32 %v239_v5, %v239_v5  ;;  %v248_v16 = vld [vmem:[%s1255_s4 + $0x268] sm:$0xff] }
  0x4f   : > { %v221_v49 = vld [vmem:[%s1255_s4 + $0x190] sm:$0xff]  ;;  %v226_v52 = vld [vmem:[%s1255_s4 + $0x1b8] sm:$0xff]  ;;  %v247_v17 = vld [vmem:[%s1255_s4 + $0x260] sm:$0xff] }
  0x50   : > { %v225_v53 = vld [vmem:[%s1255_s4 + $0x1b0] sm:$0xff]  ;;  %v230_v56 = vld [vmem:[%s1255_s4 + $0x1d8] sm:$0xff] }
  0x51   : > { %464 = vxpose.xlu1.b32.cont [6/16] %v320_v22, 128  ;;  %432 = vxpose.xlu0.b32.cont [6/16] %v319_v23, 128  ;;  %v322_v22 = vadd.f32 %v194_v20, %v194_v20  ;;  %v321_v23 = vadd.f32 %v193_v21, %v193_v21  ;;  %v229_v57 = vld [vmem:[%s1255_s4 + $0x1d0] sm:$0xff]  ;;  %v234_v60 = vld [vmem:[%s1255_s4 + $0x1f8] sm:$0xff]  ;;  %v376_v20 = vadd.f32 %v248_v16, %v248_v16 }
  0x52   : > { %v233_v61 = vld [vmem:[%s1255_s4 + $0x1f0] sm:$0xff]  ;;  %v375_v21 = vadd.f32 %v247_v17, %v247_v17 }
  0x55   : > { %465 = vxpose.xlu1.b32.cont [7/16] %v324_v26, 128  ;;  %433 = vxpose.xlu0.b32.cont [7/16] %v323_v27, 128  ;;  %v326_v26 = vadd.f32 %v198_v24, %v198_v24  ;;  %v325_v27 = vadd.f32 %v197_v25, %v197_v25 }
  0x59   : > { %466 = vxpose.xlu1.b32.cont [8/16] %v328_v30, 128  ;;  %434 = vxpose.xlu0.b32.cont [8/16] %v327_v31, 128  ;;  %v330_v30 = vadd.f32 %v202_v28, %v202_v28  ;;  %v329_v31 = vadd.f32 %v201_v29, %v201_v29  ;;  %v256_v28 = vld [vmem:[%s1255_s4 + $0x2a8] sm:$0xff]  ;;  %v255_v29 = vld [vmem:[%s1255_s4 + $0x2a0] sm:$0xff] }
  0x5d   : > { %467 = vxpose.xlu1.b32.cont [9/16] %v332_v34, 128  ;;  %435 = vxpose.xlu0.b32.cont [9/16] %v331_v35, 128  ;;  %v334_v34 = vadd.f32 %v206_v32, %v206_v32  ;;  %v333_v35 = vadd.f32 %v205_v33, %v205_v33  ;;  %v384_v32 = vadd.f32 %v256_v28, %v256_v28 }
  0x5e   : > { %v383_v33 = vadd.f32 %v255_v29, %v255_v29 }
  0x61   : > { %468 = vxpose.xlu1.b32.cont [10/16] %v336_v38, 128  ;;  %436 = vxpose.xlu0.b32.cont [10/16] %v335_v39, 128  ;;  %v338_v38 = vadd.f32 %v210_v36, %v210_v36  ;;  %v337_v39 = vadd.f32 %v209_v37, %v209_v37 }
  0x65   : > { %469 = vxpose.xlu1.b32.cont [11/16] %v340_v42, 128  ;;  %437 = vxpose.xlu0.b32.cont [11/16] %v339_v43, 128  ;;  %v342_v42 = vadd.f32 %v214_v40, %v214_v40  ;;  %v341_v43 = vadd.f32 %v213_v41, %v213_v41  ;;  %v264_v40 = vld [vmem:[%s1255_s4 + $0x2e8] sm:$0xff]  ;;  %v263_v41 = vld [vmem:[%s1255_s4 + $0x2e0] sm:$0xff] }
  0x69   : > { %470 = vxpose.xlu1.b32.cont [12/16] %v344_v46, 128  ;;  %438 = vxpose.xlu0.b32.cont [12/16] %v343_v47, 128  ;;  %v346_v46 = vadd.f32 %v218_v44, %v218_v44  ;;  %v345_v47 = vadd.f32 %v217_v45, %v217_v45  ;;  %v392_v44 = vadd.f32 %v264_v40, %v264_v40 }
  0x6a   : > { %v391_v45 = vadd.f32 %v263_v41, %v263_v41 }
  0x6d   : > { %471 = vxpose.xlu1.b32.cont [13/16] %v348_v50, 128  ;;  %439 = vxpose.xlu0.b32.cont [13/16] %v347_v51, 128  ;;  %v350_v50 = vadd.f32 %v222_v48, %v222_v48  ;;  %v349_v51 = vadd.f32 %v221_v49, %v221_v49 }
  0x71   : > { %472 = vxpose.xlu1.b32.cont [14/16] %v352_v54, 128  ;;  %440 = vxpose.xlu0.b32.cont [14/16] %v351_v55, 128  ;;  %v354_v54 = vadd.f32 %v226_v52, %v226_v52  ;;  %v353_v55 = vadd.f32 %v225_v53, %v225_v53  ;;  %v272_v52 = vld [vmem:[%s1255_s4 + $0x328] sm:$0xff]  ;;  %v271_v53 = vld [vmem:[%s1255_s4 + $0x320] sm:$0xff] }
  0x75   : > { %473 = vxpose.xlu1.b32.cont [15/16] %v356_v58, 128  ;;  %441 = vxpose.xlu0.b32.cont [15/16] %v355_v59, 128  ;;  %v358_v58 = vadd.f32 %v230_v56, %v230_v56  ;;  %v357_v59 = vadd.f32 %v229_v57, %v229_v57  ;;  %v400_v56 = vadd.f32 %v272_v52, %v272_v52 }
  0x76   : > { %v399_v57 = vadd.f32 %v271_v53, %v271_v53 }
  0x79   : > { %474 = vxpose.xlu1.b32.end [16/16] %v360_v62, 128  ;;  %442 = vxpose.xlu0.b32.end [16/16] %v359_v63, 128  ;;  %v362_v62 = vadd.f32 %v234_v60, %v234_v60  ;;  %v361_v63 = vadd.f32 %v233_v61, %v233_v61 }
  0x7d   : > { %523 = vxpose.xlu1.b32.start [1/16] %v302_v2, 128  ;;  %491 = vxpose.xlu0.b32.start [1/16] %v301_v3, 128  ;;  %v364_v2 = vadd.f32 %v236_v0, %v236_v0  ;;  %v363_v3 = vadd.f32 %v235_v1, %v235_v1  ;;  %v280_v0 = vld [vmem:[%s1255_s4 + $0x368] sm:$0xff]  ;;  %v279_v1 = vld [vmem:[%s1255_s4 + $0x360] sm:$0xff] }
  0x7e   : > { %v408_v4 = vadd.f32 %v280_v0, %v280_v0  ;;  %v407_v5 = vadd.f32 %v279_v1, %v279_v1 }
  0x81   : > { %524 = vxpose.xlu1.b32.cont [2/16] %v306_v6, 128  ;;  %492 = vxpose.xlu0.b32.cont [2/16] %v305_v7, 128 }
  0x85   : > { %525 = vxpose.xlu1.b32.cont [3/16] %v310_v10, 128  ;;  %493 = vxpose.xlu0.b32.cont [3/16] %v309_v11, 128  ;;  %v244_v10 = vld [vmem:[%s1255_s4 + $0x248] sm:$0xff]  ;;  %v243_v11 = vld [vmem:[%s1255_s4 + $0x240] sm:$0xff] }
  0x89   : > { %526 = vxpose.xlu1.b32.cont [4/16] %v314_v14, 128  ;;  %494 = vxpose.xlu0.b32.cont [4/16] %v313_v15, 128  ;;  %v372_v14 = vadd.f32 %v244_v10, %v244_v10  ;;  %v371_v15 = vadd.f32 %v243_v11, %v243_v11 }
  0x8d   : > { %527 = vxpose.xlu1.b32.cont [5/16] %v318_v18, 128  ;;  %495 = vxpose.xlu0.b32.cont [5/16] %v317_v19, 128 }
  0x91   : > { %528 = vxpose.xlu1.b32.cont [6/16] %v322_v22, 128  ;;  %496 = vxpose.xlu0.b32.cont [6/16] %v321_v23, 128  ;;  %v252_v22 = vld [vmem:[%s1255_s4 + $0x288] sm:$0xff]  ;;  %v251_v23 = vld [vmem:[%s1255_s4 + $0x280] sm:$0xff] }
  0x95   : > { %529 = vxpose.xlu1.b32.cont [7/16] %v326_v26, 128  ;;  %497 = vxpose.xlu0.b32.cont [7/16] %v325_v27, 128  ;;  %v380_v26 = vadd.f32 %v252_v22, %v252_v22  ;;  %v379_v27 = vadd.f32 %v251_v23, %v251_v23 }
  0x99   : > { %530 = vxpose.xlu1.b32.cont [8/16] %v330_v30, 128  ;;  %498 = vxpose.xlu0.b32.cont [8/16] %v329_v31, 128 }
  0x9d   : > { %531 = vxpose.xlu1.b32.cont [9/16] %v334_v34, 128  ;;  %499 = vxpose.xlu0.b32.cont [9/16] %v333_v35, 128  ;;  %v260_v34 = vld [vmem:[%s1255_s4 + $0x2c8] sm:$0xff]  ;;  %v259_v35 = vld [vmem:[%s1255_s4 + $0x2c0] sm:$0xff] }
  0xa1   : > { %532 = vxpose.xlu1.b32.cont [10/16] %v338_v38, 128  ;;  %500 = vxpose.xlu0.b32.cont [10/16] %v337_v39, 128  ;;  %v388_v38 = vadd.f32 %v260_v34, %v260_v34  ;;  %v387_v39 = vadd.f32 %v259_v35, %v259_v35 }
  0xa5   : > { %533 = vxpose.xlu1.b32.cont [11/16] %v342_v42, 128  ;;  %501 = vxpose.xlu0.b32.cont [11/16] %v341_v43, 128 }
  0xa9   : > { %534 = vxpose.xlu1.b32.cont [12/16] %v346_v46, 128  ;;  %502 = vxpose.xlu0.b32.cont [12/16] %v345_v47, 128  ;;  %v268_v46 = vld [vmem:[%s1255_s4 + $0x308] sm:$0xff]  ;;  %v267_v47 = vld [vmem:[%s1255_s4 + $0x300] sm:$0xff] }
  0xad   : > { %535 = vxpose.xlu1.b32.cont [13/16] %v350_v50, 128  ;;  %503 = vxpose.xlu0.b32.cont [13/16] %v349_v51, 128  ;;  %v396_v50 = vadd.f32 %v268_v46, %v268_v46  ;;  %v395_v51 = vadd.f32 %v267_v47, %v267_v47 }
  0xb1   : > { %536 = vxpose.xlu1.b32.cont [14/16] %v354_v54, 128  ;;  %504 = vxpose.xlu0.b32.cont [14/16] %v353_v55, 128 }
  0xb5   : > { %537 = vxpose.xlu1.b32.cont [15/16] %v358_v58, 128  ;;  %505 = vxpose.xlu0.b32.cont [15/16] %v357_v59, 128  ;;  %v276_v58 = vld [vmem:[%s1255_s4 + $0x348] sm:$0xff]  ;;  %v275_v59 = vld [vmem:[%s1255_s4 + $0x340] sm:$0xff] }
  0xb9   : > { %538 = vxpose.xlu1.b32.end [16/16] %v362_v62, 128  ;;  %506 = vxpose.xlu0.b32.end [16/16] %v361_v63, 128  ;;  %v404_v62 = vadd.f32 %v276_v58, %v276_v58  ;;  %v403_v63 = vadd.f32 %v275_v59, %v275_v59 }
  0xbd   : > { %587 = vxpose.xlu1.b32.start [1/16] %v364_v2, 128  ;;  %v475_v6 = vpop.trf.xlu1  ;;  %555 = vxpose.xlu0.b32.start [1/16] %v363_v3, 128  ;;  %v443_v7 = vpop.trf.xlu0 }
  0xbe   : > { %715 = vst [vmem:[%s1331_s18 + $0x100] sm:$0xff] %v475_v6  ;;  %683 = vst [vmem:[%s1331_s18] sm:$0xff] %v443_v7  ;;  %v284_v6 = vld [vmem:[%s1255_s4 + $0x388] sm:$0xff]  ;;  %v283_v7 = vld [vmem:[%s1255_s4 + $0x380] sm:$0xff] }
  0xbf   : > { %v412_v10 = vadd.f32 %v284_v6, %v284_v6  ;;  %v411_v11 = vadd.f32 %v283_v7, %v283_v7 }
  0xc1   : > { %588 = vxpose.xlu1.b32.cont [2/16] %v368_v8, 128  ;;  %v476_v12 = vpop.trf.xlu1  ;;  %556 = vxpose.xlu0.b32.cont [2/16] %v367_v9, 128  ;;  %v444_v13 = vpop.trf.xlu0 }
  0xc2   : > { %717 = vst [vmem:[%s1331_s18 + $0x110] sm:$0xff] %v476_v12  ;;  %685 = vst [vmem:[%s1331_s18 + $0x10] sm:$0xff] %v444_v13  ;;  %v288_v12 = vld [vmem:[%s1255_s4 + $0x3a8] sm:$0xff]  ;;  %v287_v13 = vld [vmem:[%s1255_s4 + $0x3a0] sm:$0xff] }
  0xc3   : > { %v416_v16 = vadd.f32 %v288_v12, %v288_v12  ;;  %v415_v17 = vadd.f32 %v287_v13, %v287_v13 }
  0xc5   : > { %589 = vxpose.xlu1.b32.cont [3/16] %v372_v14, 128  ;;  %v477_v18 = vpop.trf.xlu1  ;;  %557 = vxpose.xlu0.b32.cont [3/16] %v371_v15, 128  ;;  %v445_v19 = vpop.trf.xlu0 }
  0xc6   : > { %719 = vst [vmem:[%s1331_s18 + $0x120] sm:$0xff] %v477_v18  ;;  %687 = vst [vmem:[%s1331_s18 + $0x20] sm:$0xff] %v445_v19  ;;  %v292_v18 = vld [vmem:[%s1255_s4 + $0x3c8] sm:$0xff]  ;;  %v291_v19 = vld [vmem:[%s1255_s4 + $0x3c0] sm:$0xff] }
  0xc7   : > { %v420_v22 = vadd.f32 %v292_v18, %v292_v18  ;;  %v419_v23 = vadd.f32 %v291_v19, %v291_v19 }
  0xc9   : > { %590 = vxpose.xlu1.b32.cont [4/16] %v376_v20, 128  ;;  %v478_v24 = vpop.trf.xlu1  ;;  %558 = vxpose.xlu0.b32.cont [4/16] %v375_v21, 128  ;;  %v446_v25 = vpop.trf.xlu0 }
  0xca   : > { %721 = vst [vmem:[%s1331_s18 + $0x130] sm:$0xff] %v478_v24  ;;  %689 = vst [vmem:[%s1331_s18 + $0x30] sm:$0xff] %v446_v25  ;;  %v296_v24 = vld [vmem:[%s1255_s4 + $0x3e8] sm:$0xff]  ;;  %v295_v25 = vld [vmem:[%s1255_s4 + $0x3e0] sm:$0xff] }
  0xcb   : > { %v424_v28 = vadd.f32 %v296_v24, %v296_v24  ;;  %v423_v29 = vadd.f32 %v295_v25, %v295_v25 }
  0xcd   : > { %591 = vxpose.xlu1.b32.cont [5/16] %v380_v26, 128  ;;  %v479_v30 = vpop.trf.xlu1  ;;  %559 = vxpose.xlu0.b32.cont [5/16] %v379_v27, 128  ;;  %v447_v31 = vpop.trf.xlu0 }
  0xce   : > { %723 = vst [vmem:[%s1331_s18 + $0x140] sm:$0xff] %v479_v30  ;;  %691 = vst [vmem:[%s1331_s18 + $0x40] sm:$0xff] %v447_v31  ;;  %v238_v30 = vld [vmem:[%s1255_s4 + $0x218] sm:$0xff]  ;;  %v237_v31 = vld [vmem:[%s1255_s4 + $0x210] sm:$0xff] }
  0xcf   : > { %v366_v34 = vadd.f32 %v238_v30, %v238_v30  ;;  %v365_v35 = vadd.f32 %v237_v31, %v237_v31 }
  0xd1   : > { %592 = vxpose.xlu1.b32.cont [6/16] %v384_v32, 128  ;;  %v480_v36 = vpop.trf.xlu1  ;;  %560 = vxpose.xlu0.b32.cont [6/16] %v383_v33, 128  ;;  %v448_v37 = vpop.trf.xlu0 }
  0xd2   : > { %725 = vst [vmem:[%s1331_s18 + $0x150] sm:$0xff] %v480_v36  ;;  %693 = vst [vmem:[%s1331_s18 + $0x50] sm:$0xff] %v448_v37  ;;  %v242_v36 = vld [vmem:[%s1255_s4 + $0x238] sm:$0xff]  ;;  %v241_v37 = vld [vmem:[%s1255_s4 + $0x230] sm:$0xff] }
  0xd3   : > { %v370_v40 = vadd.f32 %v242_v36, %v242_v36  ;;  %v369_v41 = vadd.f32 %v241_v37, %v241_v37 }
  0xd5   : > { %593 = vxpose.xlu1.b32.cont [7/16] %v388_v38, 128  ;;  %v481_v42 = vpop.trf.xlu1  ;;  %561 = vxpose.xlu0.b32.cont [7/16] %v387_v39, 128  ;;  %v449_v43 = vpop.trf.xlu0 }
  0xd6   : > { %727 = vst [vmem:[%s1331_s18 + $0x160] sm:$0xff] %v481_v42  ;;  %695 = vst [vmem:[%s1331_s18 + $0x60] sm:$0xff] %v449_v43  ;;  %v246_v42 = vld [vmem:[%s1255_s4 + $0x258] sm:$0xff]  ;;  %v245_v43 = vld [vmem:[%s1255_s4 + $0x250] sm:$0xff] }
  0xd7   : > { %v374_v46 = vadd.f32 %v246_v42, %v246_v42  ;;  %v373_v47 = vadd.f32 %v245_v43, %v245_v43 }
  0xd9   : > { %594 = vxpose.xlu1.b32.cont [8/16] %v392_v44, 128  ;;  %v482_v48 = vpop.trf.xlu1  ;;  %562 = vxpose.xlu0.b32.cont [8/16] %v391_v45, 128  ;;  %v450_v49 = vpop.trf.xlu0 }
  0xda   : > { %729 = vst [vmem:[%s1331_s18 + $0x170] sm:$0xff] %v482_v48  ;;  %697 = vst [vmem:[%s1331_s18 + $0x70] sm:$0xff] %v450_v49  ;;  %v250_v48 = vld [vmem:[%s1255_s4 + $0x278] sm:$0xff]  ;;  %v249_v49 = vld [vmem:[%s1255_s4 + $0x270] sm:$0xff] }
  0xdb   : > { %v378_v52 = vadd.f32 %v250_v48, %v250_v48  ;;  %v377_v53 = vadd.f32 %v249_v49, %v249_v49 }
  0xdd   : > { %595 = vxpose.xlu1.b32.cont [9/16] %v396_v50, 128  ;;  %v483_v54 = vpop.trf.xlu1  ;;  %563 = vxpose.xlu0.b32.cont [9/16] %v395_v51, 128  ;;  %v451_v55 = vpop.trf.xlu0 }
  0xde   : > { %731 = vst [vmem:[%s1331_s18 + $0x180] sm:$0xff] %v483_v54  ;;  %699 = vst [vmem:[%s1331_s18 + $0x80] sm:$0xff] %v451_v55  ;;  %v254_v54 = vld [vmem:[%s1255_s4 + $0x298] sm:$0xff]  ;;  %v253_v55 = vld [vmem:[%s1255_s4 + $0x290] sm:$0xff] }
  0xdf   : > { %v382_v58 = vadd.f32 %v254_v54, %v254_v54  ;;  %v381_v59 = vadd.f32 %v253_v55, %v253_v55 }
  0xe1   : > { %596 = vxpose.xlu1.b32.cont [10/16] %v400_v56, 128  ;;  %v484_v60 = vpop.trf.xlu1  ;;  %564 = vxpose.xlu0.b32.cont [10/16] %v399_v57, 128  ;;  %v452_v61 = vpop.trf.xlu0 }
  0xe2   : > { %733 = vst [vmem:[%s1331_s18 + $0x190] sm:$0xff] %v484_v60  ;;  %701 = vst [vmem:[%s1331_s18 + $0x90] sm:$0xff] %v452_v61  ;;  %v258_v60 = vld [vmem:[%s1255_s4 + $0x2b8] sm:$0xff]  ;;  %v257_v61 = vld [vmem:[%s1255_s4 + $0x2b0] sm:$0xff] }
  0xe3   : > { %v386_v0 = vadd.f32 %v258_v60, %v258_v60  ;;  %v385_v1 = vadd.f32 %v257_v61, %v257_v61 }
  0xe5   : > { %597 = vxpose.xlu1.b32.cont [11/16] %v404_v62, 128  ;;  %v485_v2 = vpop.trf.xlu1  ;;  %565 = vxpose.xlu0.b32.cont [11/16] %v403_v63, 128  ;;  %v453_v3 = vpop.trf.xlu0 }
  0xe6   : > { %735 = vst [vmem:[%s1331_s18 + $0x1a0] sm:$0xff] %v485_v2  ;;  %703 = vst [vmem:[%s1331_s18 + $0xa0] sm:$0xff] %v453_v3  ;;  %v262_v2 = vld [vmem:[%s1255_s4 + $0x2d8] sm:$0xff]  ;;  %v261_v3 = vld [vmem:[%s1255_s4 + $0x2d0] sm:$0xff] }
  0xe7   : > { %v390_v6 = vadd.f32 %v262_v2, %v262_v2  ;;  %v389_v7 = vadd.f32 %v261_v3, %v261_v3 }
  0xe9   : > { %598 = vxpose.xlu1.b32.cont [12/16] %v408_v4, 128  ;;  %v486_v8 = vpop.trf.xlu1  ;;  %566 = vxpose.xlu0.b32.cont [12/16] %v407_v5, 128  ;;  %v454_v9 = vpop.trf.xlu0 }
  0xea   : > { %737 = vst [vmem:[%s1331_s18 + $0x1b0] sm:$0xff] %v486_v8  ;;  %705 = vst [vmem:[%s1331_s18 + $0xb0] sm:$0xff] %v454_v9  ;;  %v266_v8 = vld [vmem:[%s1255_s4 + $0x2f8] sm:$0xff]  ;;  %v265_v9 = vld [vmem:[%s1255_s4 + $0x2f0] sm:$0xff] }
  0xeb   : > { %v394_v12 = vadd.f32 %v266_v8, %v266_v8  ;;  %v393_v13 = vadd.f32 %v265_v9, %v265_v9 }
  0xed   : > { %599 = vxpose.xlu1.b32.cont [13/16] %v412_v10, 128  ;;  %v487_v14 = vpop.trf.xlu1  ;;  %567 = vxpose.xlu0.b32.cont [13/16] %v411_v11, 128  ;;  %v455_v15 = vpop.trf.xlu0 }
  0xee   : > { %739 = vst [vmem:[%s1331_s18 + $0x1c0] sm:$0xff] %v487_v14  ;;  %707 = vst [vmem:[%s1331_s18 + $0xc0] sm:$0xff] %v455_v15  ;;  %v270_v14 = vld [vmem:[%s1255_s4 + $0x318] sm:$0xff]  ;;  %v269_v15 = vld [vmem:[%s1255_s4 + $0x310] sm:$0xff] }
  0xef   : > { %v398_v18 = vadd.f32 %v270_v14, %v270_v14  ;;  %v397_v19 = vadd.f32 %v269_v15, %v269_v15 }
  0xf1   : > { %600 = vxpose.xlu1.b32.cont [14/16] %v416_v16, 128  ;;  %v488_v20 = vpop.trf.xlu1  ;;  %568 = vxpose.xlu0.b32.cont [14/16] %v415_v17, 128  ;;  %v456_v21 = vpop.trf.xlu0 }
  0xf2   : > { %741 = vst [vmem:[%s1331_s18 + $0x1d0] sm:$0xff] %v488_v20  ;;  %709 = vst [vmem:[%s1331_s18 + $0xd0] sm:$0xff] %v456_v21  ;;  %v274_v20 = vld [vmem:[%s1255_s4 + $0x338] sm:$0xff]  ;;  %v273_v21 = vld [vmem:[%s1255_s4 + $0x330] sm:$0xff] }
  0xf3   : > { %v402_v24 = vadd.f32 %v274_v20, %v274_v20  ;;  %v401_v25 = vadd.f32 %v273_v21, %v273_v21 }
  0xf5   : > { %601 = vxpose.xlu1.b32.cont [15/16] %v420_v22, 128  ;;  %v489_v26 = vpop.trf.xlu1  ;;  %569 = vxpose.xlu0.b32.cont [15/16] %v419_v23, 128  ;;  %v457_v27 = vpop.trf.xlu0 }
  0xf6   : > { %743 = vst [vmem:[%s1331_s18 + $0x1e0] sm:$0xff] %v489_v26  ;;  %711 = vst [vmem:[%s1331_s18 + $0xe0] sm:$0xff] %v457_v27  ;;  %v278_v26 = vld [vmem:[%s1255_s4 + $0x358] sm:$0xff]  ;;  %v277_v27 = vld [vmem:[%s1255_s4 + $0x350] sm:$0xff] }
  0xf7   : > { %v406_v30 = vadd.f32 %v278_v26, %v278_v26  ;;  %v405_v31 = vadd.f32 %v277_v27, %v277_v27 }
  0xf9   : > { %602 = vxpose.xlu1.b32.end [16/16] %v424_v28, 128  ;;  %v490_v32 = vpop.trf.xlu1  ;;  %570 = vxpose.xlu0.b32.end [16/16] %v423_v29, 128  ;;  %v458_v33 = vpop.trf.xlu0 }
  0xfa   : > { %745 = vst [vmem:[%s1331_s18 + $0x1f0] sm:$0xff] %v490_v32  ;;  %713 = vst [vmem:[%s1331_s18 + $0xf0] sm:$0xff] %v458_v33  ;;  %v282_v32 = vld [vmem:[%s1255_s4 + $0x378] sm:$0xff]  ;;  %v281_v33 = vld [vmem:[%s1255_s4 + $0x370] sm:$0xff] }
  0xfb   : > { %v410_v36 = vadd.f32 %v282_v32, %v282_v32  ;;  %v409_v37 = vadd.f32 %v281_v33, %v281_v33 }
  0xfd   : > { %651 = vxpose.xlu1.b32.start [1/16] %v366_v34, 128  ;;  %v539_v38 = vpop.trf.xlu1  ;;  %619 = vxpose.xlu0.b32.start [1/16] %v365_v35, 128  ;;  %v507_v39 = vpop.trf.xlu0 }
  0xfe   : > { %779 = vst [vmem:[%s1331_s18 + $0x300] sm:$0xff] %v539_v38  ;;  %747 = vst [vmem:[%s1331_s18 + $0x200] sm:$0xff] %v507_v39  ;;  %v286_v38 = vld [vmem:[%s1255_s4 + $0x398] sm:$0xff]  ;;  %v285_v39 = vld [vmem:[%s1255_s4 + $0x390] sm:$0xff] }
  0xff   : > { %v414_v42 = vadd.f32 %v286_v38, %v286_v38  ;;  %v413_v43 = vadd.f32 %v285_v39, %v285_v39 }
 0x101   : > { %652 = vxpose.xlu1.b32.cont [2/16] %v370_v40, 128  ;;  %v540_v44 = vpop.trf.xlu1  ;;  %620 = vxpose.xlu0.b32.cont [2/16] %v369_v41, 128  ;;  %v508_v45 = vpop.trf.xlu0 }
 0x102   : > { %781 = vst [vmem:[%s1331_s18 + $0x310] sm:$0xff] %v540_v44  ;;  %749 = vst [vmem:[%s1331_s18 + $0x210] sm:$0xff] %v508_v45  ;;  %v290_v44 = vld [vmem:[%s1255_s4 + $0x3b8] sm:$0xff]  ;;  %v289_v45 = vld [vmem:[%s1255_s4 + $0x3b0] sm:$0xff] }
 0x103   : > { %v418_v48 = vadd.f32 %v290_v44, %v290_v44  ;;  %v417_v49 = vadd.f32 %v289_v45, %v289_v45 }
 0x105   : > { %653 = vxpose.xlu1.b32.cont [3/16] %v374_v46, 128  ;;  %v541_v50 = vpop.trf.xlu1  ;;  %621 = vxpose.xlu0.b32.cont [3/16] %v373_v47, 128  ;;  %v509_v51 = vpop.trf.xlu0 }
 0x106   : > { %783 = vst [vmem:[%s1331_s18 + $0x320] sm:$0xff] %v541_v50  ;;  %751 = vst [vmem:[%s1331_s18 + $0x220] sm:$0xff] %v509_v51  ;;  %v294_v50 = vld [vmem:[%s1255_s4 + $0x3d8] sm:$0xff]  ;;  %v293_v51 = vld [vmem:[%s1255_s4 + $0x3d0] sm:$0xff] }
 0x107   : > { %v422_v54 = vadd.f32 %v294_v50, %v294_v50  ;;  %v421_v55 = vadd.f32 %v293_v51, %v293_v51 }
 0x109   : > { %654 = vxpose.xlu1.b32.cont [4/16] %v378_v52, 128  ;;  %v542_v56 = vpop.trf.xlu1  ;;  %622 = vxpose.xlu0.b32.cont [4/16] %v377_v53, 128  ;;  %v510_v57 = vpop.trf.xlu0 }
 0x10a   : > { %785 = vst [vmem:[%s1331_s18 + $0x330] sm:$0xff] %v542_v56  ;;  %753 = vst [vmem:[%s1331_s18 + $0x230] sm:$0xff] %v510_v57  ;;  %v298_v56 = vld [vmem:[%s1255_s4 + $0x3f8] sm:$0xff]  ;;  %v297_v57 = vld [vmem:[%s1255_s4 + $0x3f0] sm:$0xff] }
 0x10b   : > { %v426_v60 = vadd.f32 %v298_v56, %v298_v56  ;;  %v425_v61 = vadd.f32 %v297_v57, %v297_v57 }
 0x10d   : > { %655 = vxpose.xlu1.b32.cont [5/16] %v382_v58, 128  ;;  %v543_v62 = vpop.trf.xlu1  ;;  %623 = vxpose.xlu0.b32.cont [5/16] %v381_v59, 128  ;;  %v511_v63 = vpop.trf.xlu0 }
 0x10e   : > { %787 = vst [vmem:[%s1331_s18 + $0x340] sm:$0xff] %v543_v62  ;;  %755 = vst [vmem:[%s1331_s18 + $0x240] sm:$0xff] %v511_v63 }
 0x111   : > { %656 = vxpose.xlu1.b32.cont [6/16] %v386_v0, 128  ;;  %v544_v4 = vpop.trf.xlu1  ;;  %624 = vxpose.xlu0.b32.cont [6/16] %v385_v1, 128  ;;  %v512_v5 = vpop.trf.xlu0 }
 0x112   : > { %789 = vst [vmem:[%s1331_s18 + $0x350] sm:$0xff] %v544_v4  ;;  %757 = vst [vmem:[%s1331_s18 + $0x250] sm:$0xff] %v512_v5 }
 0x115   : > { %657 = vxpose.xlu1.b32.cont [7/16] %v390_v6, 128  ;;  %v545_v10 = vpop.trf.xlu1  ;;  %625 = vxpose.xlu0.b32.cont [7/16] %v389_v7, 128  ;;  %v513_v11 = vpop.trf.xlu0 }
 0x116   : > { %791 = vst [vmem:[%s1331_s18 + $0x360] sm:$0xff] %v545_v10  ;;  %759 = vst [vmem:[%s1331_s18 + $0x260] sm:$0xff] %v513_v11 }
 0x119   : > { %658 = vxpose.xlu1.b32.cont [8/16] %v394_v12, 128  ;;  %v546_v16 = vpop.trf.xlu1  ;;  %626 = vxpose.xlu0.b32.cont [8/16] %v393_v13, 128  ;;  %v514_v17 = vpop.trf.xlu0 }
 0x11a   : > { %793 = vst [vmem:[%s1331_s18 + $0x370] sm:$0xff] %v546_v16  ;;  %761 = vst [vmem:[%s1331_s18 + $0x270] sm:$0xff] %v514_v17 }
 0x11d   : > { %659 = vxpose.xlu1.b32.cont [9/16] %v398_v18, 128  ;;  %v547_v22 = vpop.trf.xlu1  ;;  %627 = vxpose.xlu0.b32.cont [9/16] %v397_v19, 128  ;;  %v515_v23 = vpop.trf.xlu0 }
 0x11e   : > { %795 = vst [vmem:[%s1331_s18 + $0x380] sm:$0xff] %v547_v22  ;;  %763 = vst [vmem:[%s1331_s18 + $0x280] sm:$0xff] %v515_v23 }
 0x121   : > { %660 = vxpose.xlu1.b32.cont [10/16] %v402_v24, 128  ;;  %v548_v28 = vpop.trf.xlu1  ;;  %628 = vxpose.xlu0.b32.cont [10/16] %v401_v25, 128  ;;  %v516_v29 = vpop.trf.xlu0 }
 0x122   : > { %797 = vst [vmem:[%s1331_s18 + $0x390] sm:$0xff] %v548_v28  ;;  %765 = vst [vmem:[%s1331_s18 + $0x290] sm:$0xff] %v516_v29 }
 0x125   : > { %661 = vxpose.xlu1.b32.cont [11/16] %v406_v30, 128  ;;  %v549_v34 = vpop.trf.xlu1  ;;  %629 = vxpose.xlu0.b32.cont [11/16] %v405_v31, 128  ;;  %v517_v35 = vpop.trf.xlu0 }
 0x126   : > { %799 = vst [vmem:[%s1331_s18 + $0x3a0] sm:$0xff] %v549_v34  ;;  %767 = vst [vmem:[%s1331_s18 + $0x2a0] sm:$0xff] %v517_v35 }
 0x129   : > { %662 = vxpose.xlu1.b32.cont [12/16] %v410_v36, 128  ;;  %v550_v40 = vpop.trf.xlu1  ;;  %630 = vxpose.xlu0.b32.cont [12/16] %v409_v37, 128  ;;  %v518_v41 = vpop.trf.xlu0 }
 0x12a   : > { %801 = vst [vmem:[%s1331_s18 + $0x3b0] sm:$0xff] %v550_v40  ;;  %769 = vst [vmem:[%s1331_s18 + $0x2b0] sm:$0xff] %v518_v41 }
 0x12d   : > { %663 = vxpose.xlu1.b32.cont [13/16] %v414_v42, 128  ;;  %v551_v46 = vpop.trf.xlu1  ;;  %631 = vxpose.xlu0.b32.cont [13/16] %v413_v43, 128  ;;  %v519_v47 = vpop.trf.xlu0 }
 0x12e   : > { %803 = vst [vmem:[%s1331_s18 + $0x3c0] sm:$0xff] %v551_v46  ;;  %771 = vst [vmem:[%s1331_s18 + $0x2c0] sm:$0xff] %v519_v47 }
 0x131   : > { %664 = vxpose.xlu1.b32.cont [14/16] %v418_v48, 128  ;;  %v552_v52 = vpop.trf.xlu1  ;;  %632 = vxpose.xlu0.b32.cont [14/16] %v417_v49, 128  ;;  %v520_v53 = vpop.trf.xlu0 }
 0x132   : > { %805 = vst [vmem:[%s1331_s18 + $0x3d0] sm:$0xff] %v552_v52  ;;  %773 = vst [vmem:[%s1331_s18 + $0x2d0] sm:$0xff] %v520_v53 }
 0x135   : > { %665 = vxpose.xlu1.b32.cont [15/16] %v422_v54, 128  ;;  %v553_v58 = vpop.trf.xlu1  ;;  %633 = vxpose.xlu0.b32.cont [15/16] %v421_v55, 128  ;;  %v521_v59 = vpop.trf.xlu0 }
 0x136   : > { %807 = vst [vmem:[%s1331_s18 + $0x3e0] sm:$0xff] %v553_v58  ;;  %775 = vst [vmem:[%s1331_s18 + $0x2e0] sm:$0xff] %v521_v59 }
 0x139   : > { %666 = vxpose.xlu1.b32.end [16/16] %v426_v60, 128  ;;  %v554_v62 = vpop.trf.xlu1  ;;  %634 = vxpose.xlu0.b32.end [16/16] %v425_v61, 128  ;;  %v522_v63 = vpop.trf.xlu0 }
 0x13a   : > { %809 = vst [vmem:[%s1331_s18 + $0x3f0] sm:$0xff] %v554_v62  ;;  %777 = vst [vmem:[%s1331_s18 + $0x2f0] sm:$0xff] %v522_v63 }
 0x13d   : > { %v603_v0 = vpop.trf.xlu1  ;;  %v571_v1 = vpop.trf.xlu0 }
 0x13e   : > { %716 = vst [vmem:[%s1331_s18 + $0x108] sm:$0xff] %v603_v0  ;;  %684 = vst [vmem:[%s1331_s18 + $0x8] sm:$0xff] %v571_v1 }
 0x141   : > { %v604_v2 = vpop.trf.xlu1  ;;  %v572_v3 = vpop.trf.xlu0 }
 0x142   : > { %718 = vst [vmem:[%s1331_s18 + $0x118] sm:$0xff] %v604_v2  ;;  %686 = vst [vmem:[%s1331_s18 + $0x18] sm:$0xff] %v572_v3 }
 0x145   : > { %v605_v4 = vpop.trf.xlu1  ;;  %v573_v5 = vpop.trf.xlu0 }
 0x146   : > { %720 = vst [vmem:[%s1331_s18 + $0x128] sm:$0xff] %v605_v4  ;;  %688 = vst [vmem:[%s1331_s18 + $0x28] sm:$0xff] %v573_v5 }
 0x149   : > { %v606_v6 = vpop.trf.xlu1  ;;  %v574_v7 = vpop.trf.xlu0 }
 0x14a   : > { %722 = vst [vmem:[%s1331_s18 + $0x138] sm:$0xff] %v606_v6  ;;  %690 = vst [vmem:[%s1331_s18 + $0x38] sm:$0xff] %v574_v7 }
 0x14d   : > { %v607_v8 = vpop.trf.xlu1  ;;  %v575_v9 = vpop.trf.xlu0 }
 0x14e   : > { %724 = vst [vmem:[%s1331_s18 + $0x148] sm:$0xff] %v607_v8  ;;  %692 = vst [vmem:[%s1331_s18 + $0x48] sm:$0xff] %v575_v9 }
 0x151   : > { %v608_v10 = vpop.trf.xlu1  ;;  %v576_v11 = vpop.trf.xlu0 }
 0x152   : > { %726 = vst [vmem:[%s1331_s18 + $0x158] sm:$0xff] %v608_v10  ;;  %694 = vst [vmem:[%s1331_s18 + $0x58] sm:$0xff] %v576_v11 }
 0x155   : > { %v609_v12 = vpop.trf.xlu1  ;;  %v577_v13 = vpop.trf.xlu0 }
 0x156   : > { %728 = vst [vmem:[%s1331_s18 + $0x168] sm:$0xff] %v609_v12  ;;  %696 = vst [vmem:[%s1331_s18 + $0x68] sm:$0xff] %v577_v13 }
 0x159   : > { %v610_v14 = vpop.trf.xlu1  ;;  %v578_v15 = vpop.trf.xlu0 }
 0x15a   : > { %730 = vst [vmem:[%s1331_s18 + $0x178] sm:$0xff] %v610_v14  ;;  %698 = vst [vmem:[%s1331_s18 + $0x78] sm:$0xff] %v578_v15 }
 0x15d   : > { %v611_v16 = vpop.trf.xlu1  ;;  %v579_v17 = vpop.trf.xlu0 }
 0x15e   : > { %732 = vst [vmem:[%s1331_s18 + $0x188] sm:$0xff] %v611_v16  ;;  %700 = vst [vmem:[%s1331_s18 + $0x88] sm:$0xff] %v579_v17 }
 0x161   : > { %v612_v18 = vpop.trf.xlu1  ;;  %v580_v19 = vpop.trf.xlu0 }
 0x162   : > { %734 = vst [vmem:[%s1331_s18 + $0x198] sm:$0xff] %v612_v18  ;;  %702 = vst [vmem:[%s1331_s18 + $0x98] sm:$0xff] %v580_v19 }
 0x165   : > { %v613_v20 = vpop.trf.xlu1  ;;  %v581_v21 = vpop.trf.xlu0 }
 0x166   : > { %736 = vst [vmem:[%s1331_s18 + $0x1a8] sm:$0xff] %v613_v20  ;;  %704 = vst [vmem:[%s1331_s18 + $0xa8] sm:$0xff] %v581_v21 }
 0x169   : > { %v614_v22 = vpop.trf.xlu1  ;;  %v582_v23 = vpop.trf.xlu0 }
 0x16a   : > { %738 = vst [vmem:[%s1331_s18 + $0x1b8] sm:$0xff] %v614_v22  ;;  %706 = vst [vmem:[%s1331_s18 + $0xb8] sm:$0xff] %v582_v23 }
 0x16d   : > { %v615_v24 = vpop.trf.xlu1  ;;  %v583_v25 = vpop.trf.xlu0 }
 0x16e   : > { %740 = vst [vmem:[%s1331_s18 + $0x1c8] sm:$0xff] %v615_v24  ;;  %708 = vst [vmem:[%s1331_s18 + $0xc8] sm:$0xff] %v583_v25 }
 0x171   : > { %v616_v26 = vpop.trf.xlu1  ;;  %v584_v27 = vpop.trf.xlu0 }
 0x172   : > { %742 = vst [vmem:[%s1331_s18 + $0x1d8] sm:$0xff] %v616_v26  ;;  %710 = vst [vmem:[%s1331_s18 + $0xd8] sm:$0xff] %v584_v27 }
 0x175   : > { %v617_v28 = vpop.trf.xlu1  ;;  %v585_v29 = vpop.trf.xlu0 }
 0x176   : > { %744 = vst [vmem:[%s1331_s18 + $0x1e8] sm:$0xff] %v617_v28  ;;  %712 = vst [vmem:[%s1331_s18 + $0xe8] sm:$0xff] %v585_v29 }
 0x179   : > { %v618_v30 = vpop.trf.xlu1  ;;  %v586_v31 = vpop.trf.xlu0 }
 0x17a   : > { %746 = vst [vmem:[%s1331_s18 + $0x1f8] sm:$0xff] %v618_v30  ;;  %714 = vst [vmem:[%s1331_s18 + $0xf8] sm:$0xff] %v586_v31 }
 0x17d   : > { %v667_v32 = vpop.trf.xlu1  ;;  %v635_v33 = vpop.trf.xlu0 }
 0x17e   : > { %780 = vst [vmem:[%s1331_s18 + $0x308] sm:$0xff] %v667_v32  ;;  %748 = vst [vmem:[%s1331_s18 + $0x208] sm:$0xff] %v635_v33 }
 0x181   : > { %v668_v34 = vpop.trf.xlu1  ;;  %v636_v35 = vpop.trf.xlu0 }
 0x182   : > { %782 = vst [vmem:[%s1331_s18 + $0x318] sm:$0xff] %v668_v34  ;;  %750 = vst [vmem:[%s1331_s18 + $0x218] sm:$0xff] %v636_v35 }
 0x185   : > { %v669_v36 = vpop.trf.xlu1  ;;  %v637_v37 = vpop.trf.xlu0 }
 0x186   : > { %784 = vst [vmem:[%s1331_s18 + $0x328] sm:$0xff] %v669_v36  ;;  %752 = vst [vmem:[%s1331_s18 + $0x228] sm:$0xff] %v637_v37 }
 0x189   : > { %v670_v38 = vpop.trf.xlu1  ;;  %v638_v39 = vpop.trf.xlu0 }
 0x18a   : > { %786 = vst [vmem:[%s1331_s18 + $0x338] sm:$0xff] %v670_v38  ;;  %754 = vst [vmem:[%s1331_s18 + $0x238] sm:$0xff] %v638_v39 }
 0x18d   : > { %v671_v40 = vpop.trf.xlu1  ;;  %v639_v41 = vpop.trf.xlu0 }
 0x18e   : > { %788 = vst [vmem:[%s1331_s18 + $0x348] sm:$0xff] %v671_v40  ;;  %756 = vst [vmem:[%s1331_s18 + $0x248] sm:$0xff] %v639_v41 }
 0x191   : > { %v672_v42 = vpop.trf.xlu1  ;;  %v640_v43 = vpop.trf.xlu0 }
 0x192   : > { %790 = vst [vmem:[%s1331_s18 + $0x358] sm:$0xff] %v672_v42  ;;  %758 = vst [vmem:[%s1331_s18 + $0x258] sm:$0xff] %v640_v43 }
 0x195   : > { %v673_v44 = vpop.trf.xlu1  ;;  %v641_v45 = vpop.trf.xlu0 }
 0x196   : > { %792 = vst [vmem:[%s1331_s18 + $0x368] sm:$0xff] %v673_v44  ;;  %760 = vst [vmem:[%s1331_s18 + $0x268] sm:$0xff] %v641_v45 }
 0x199   : > { %v674_v46 = vpop.trf.xlu1  ;;  %v642_v47 = vpop.trf.xlu0 }
 0x19a   : > { %794 = vst [vmem:[%s1331_s18 + $0x378] sm:$0xff] %v674_v46  ;;  %762 = vst [vmem:[%s1331_s18 + $0x278] sm:$0xff] %v642_v47 }
 0x19d   : > { %v675_v48 = vpop.trf.xlu1  ;;  %v643_v49 = vpop.trf.xlu0 }
 0x19e   : > { %796 = vst [vmem:[%s1331_s18 + $0x388] sm:$0xff] %v675_v48  ;;  %764 = vst [vmem:[%s1331_s18 + $0x288] sm:$0xff] %v643_v49 }
 0x1a1   : > { %v676_v50 = vpop.trf.xlu1  ;;  %v644_v51 = vpop.trf.xlu0 }
 0x1a2   : > { %798 = vst [vmem:[%s1331_s18 + $0x398] sm:$0xff] %v676_v50  ;;  %766 = vst [vmem:[%s1331_s18 + $0x298] sm:$0xff] %v644_v51 }
 0x1a5   : > { %v677_v52 = vpop.trf.xlu1  ;;  %v645_v53 = vpop.trf.xlu0 }
 0x1a6   : > { %800 = vst [vmem:[%s1331_s18 + $0x3a8] sm:$0xff] %v677_v52  ;;  %768 = vst [vmem:[%s1331_s18 + $0x2a8] sm:$0xff] %v645_v53 }
 0x1a9   : > { %v678_v54 = vpop.trf.xlu1  ;;  %v646_v55 = vpop.trf.xlu0 }
 0x1aa   : > { %802 = vst [vmem:[%s1331_s18 + $0x3b8] sm:$0xff] %v678_v54  ;;  %770 = vst [vmem:[%s1331_s18 + $0x2b8] sm:$0xff] %v646_v55 }
 0x1ad   : > { %v679_v56 = vpop.trf.xlu1  ;;  %v647_v57 = vpop.trf.xlu0 }
 0x1ae   : > { %804 = vst [vmem:[%s1331_s18 + $0x3c8] sm:$0xff] %v679_v56  ;;  %772 = vst [vmem:[%s1331_s18 + $0x2c8] sm:$0xff] %v647_v57 }
 0x1b1   : > { %v680_v58 = vpop.trf.xlu1  ;;  %v648_v59 = vpop.trf.xlu0 }
 0x1b2   : > { %806 = vst [vmem:[%s1331_s18 + $0x3d8] sm:$0xff] %v680_v58  ;;  %774 = vst [vmem:[%s1331_s18 + $0x2d8] sm:$0xff] %v648_v59 }
 0x1b5   : > { %v681_v60 = vpop.trf.xlu1  ;;  %v649_v61 = vpop.trf.xlu0 }
 0x1b6   : > { %808 = vst [vmem:[%s1331_s18 + $0x3e8] sm:$0xff] %v681_v60  ;;  %776 = vst [vmem:[%s1331_s18 + $0x2e8] sm:$0xff] %v649_v61 }
 0x1b9   : > { %v682_v62 = vpop.trf.xlu1  ;;  %v650_v63 = vpop.trf.xlu0 }
 0x1ba   : > { %810 = vst [vmem:[%s1331_s18 + $0x3f8] sm:$0xff] %v682_v62  ;;  %778 = vst [vmem:[%s1331_s18 + $0x2f8] sm:$0xff] %v650_v63 }
 0x1bb   : > { %1050 = shalt.err (!%p1047_p5)
}
 0x1bc   : > { %s1051_s17 = scalar_lea.hbm %s1524_s5, 16384  ;;  %s1055_s24 = scalar_lea.hbm %s1578_s1, 32768 }
 0x1bd   : > { %p1052_p4 = scmp.ne.s32.totalorder %s1524_s5, %s1051_s17  ;;  %p1056_p12 = scmp.lt.u32.totalorder %s1524_s5, %s1578_s1 }
 0x1be   : > { %p1057_p1 = scmp.lt.u32.totalorder %s1055_s24, %s1051_s17  ;;  %p1059_p8 = scmp.lt.u32.totalorder %s1051_s17, %s1524_s5 }
 0x1bf   : > { %p1053_p7 = pnand %p1052_p4, %p1586_p9 }
 0x1c0   : > { %p1058_p3 = por %p1057_p1, %p1056_p12 }
 0x1c1   : > { %p1054_p10 = pneg %p1053_p7 }
 0x1c2   : > { %p1060_p11 = por %p1059_p8, %p1058_p3 }
 0x1c4   : > { %p1061_p0 = pnand %p1060_p11, %p1054_p10 }
 0x1c6   : > { %1064 = shalt.err (!%p1061_p0)
}
 0x1c7   : > { %s1125_s3 = smov 256   ;;  %s1126_s4 = smov 16  }
 0x1c8   : > { %943 = dma.vmem_to_hbm [thread:$0]  (%p1586_p9), %s1526_s29, 16384, %s1524_s5, %s812_s9, %s1125_s3, %s1125_s3, %s1126_s4  }
 0x1c9 PF: > { %s845_s18 = sand.u32 1, %s1099_s6   ;;  %p1587_p6 = scmp.ne.s32.totalorder %s1583_s21, 0 }
 0x1ca   : > { %p1588_p13 = scmp.ge.s32.totalorder %s1119_s11, 2  ;;  %s846_s27 = scalar_lea.sflag [#allocation4], %s845_s18 }
 0x1cc   : > { %p950_p2 = pnand %p1588_p13, %p1587_p6 }
 0x1ce   : > { %1094 = dma.done.wait (!%p950_p2), %s846_s27, 16384  }
 0x1cf   : > { %1096 = vsyncadd (!%p950_p2), %s846_s27, 4294950912  ;;  %s17_s11 = sadd.s32 1, %s1119_s11   ;;  %s1589_s6 = smov %s1103_s7 }
 0x1d0   : > { %p14_p5 = scmp.ge.s32.totalorder %s17_s11, 4   ;;  %s1590_s7 = smov %s1107_s8 }
 0x1d1   : > { %s1591_s8 = smov %s1193_s20  ;;  %s1592_s9 = smov %s1115_s10 }
 0x1d2   : > { %s1593_s10 = smov %s1595_s14  ;;  %16 = sbr.rel (!%p14_p5) target bundleno = 6 (0x6), region = 69 }
 0x1d9   :  { %851 = vsyncpa [#allocation3], 1 }
 0x1da   :  { %853 = vsyncpa [#allocation3 + $0x1], 1 }
 0x1db   :  { %854 = vsyncpa [#allocation4], 1 }
 0x1dc   :  { %856 = vsyncpa [#allocation4 + $0x1], 1 }

</bundles_post_ra>
